<compile_context>
chip_gen: v7x
topology: tpu7x:2x2x1
jax: 0.10.0
libtpu: 0.0.40
codegen_flags: <defaults>
</compile_context>

<pallas_src>
import numpy as np
import jax
import jax.numpy as jnp
from jax.experimental import pallas as pl
from jax.experimental.pallas import tpu as pltpu


def _vmem_capacity_bytes():
    try:
        return int(pltpu.get_tpu_info().vmem_capacity_bytes)
    except Exception:
        return 64 * 1024 * 1024  # conservative (v7x-sized) default


def _pick_plane_batch(num_planes, in_plane_bytes, out_plane_bytes, block_budget):
    """Largest divisor of num_planes whose double-buffered in+out blocks fit."""
    per_plane = 2 * (in_plane_bytes + out_plane_bytes)  # worst case (fallback path)
    tb_max = max(1, min(num_planes, block_budget // max(per_plane, 1)))
    for d in range(int(tb_max), 0, -1):
        if num_planes % d == 0:
            return d
    return 1


def make_center_crop(in_dim, out_dim):
    """Returns (crop_fn, (h0, h1, w0, w1)) matching the PyTorch CenterCrop."""
    in_dim = tuple(int(d) for d in in_dim)
    out_dim = tuple(int(d) for d in out_dim)

    # Same arithmetic as the PyTorch __init__.
    crop_h0 = (in_dim[0] - out_dim[0]) // 2
    crop_h1 = in_dim[0] - out_dim[0] - crop_h0
    crop_w0 = (in_dim[1] - out_dim[1]) // 2
    crop_w1 = in_dim[1] - out_dim[1] - crop_w0
    assert crop_h1 > 0 and crop_w1 > 0, (
        "PyTorch forward uses negative-stop slicing; requires a nonzero crop "
        "on the trailing side of both spatial axes."
    )

    H_in, W_in = in_dim
    H_out, W_out = out_dim

    # ---- generation-aware sizing -----------------------------------------
    vmem_cap = _vmem_capacity_bytes()      # ~128 MiB on v5e/v6e, ~64 MiB on v7x
    block_budget = vmem_cap // 4           # budget for live double-buffered blocks
    vmem_limit = vmem_cap // 2             # explicit scoped-VMEM limit

    compiler_params = pltpu.CompilerParams(
        dimension_semantics=("parallel",),  # v7x: shard the grid over both TCs
        vmem_limit_bytes=int(vmem_limit),
    )

    def _dma_crop_kernel(x_hbm, o_ref, sem):
        # Pure-DMA body: strided-copy exactly the cropped window of TB planes
        # from HBM straight into the pipelined output block. No vreg traffic,
        # no lane shift, no masked stores.
        tb = o_ref.shape[0]
        p0 = pl.multiple_of(pl.program_id(0) * tb, tb)
        cp = pltpu.make_async_copy(
            x_hbm.at[pl.ds(p0, tb),
                     pl.ds(crop_h0, H_out),
                     pl.ds(crop_w0, W_out)],
            o_ref,
            sem.at[0],
        )
        cp.start()
        cp.wait()

    def _vmem_crop_kernel(x_ref, o_ref):
        # Fallback body: full-plane block already in VMEM; static center slice.
        o_ref[...] = x_ref[:, crop_h0:crop_h0 + H_out, crop_w0:crop_w0 + W_out]

    def _call(x3, tb, use_dma_crop):
        B = x3.shape[0]
        grid = (B // tb,)
        out_shape = jax.ShapeDtypeStruct((B, H_out, W_out), x3.dtype)
        out_spec = pl.BlockSpec((tb, H_out, W_out), lambda b: (b, 0, 0))
        if use_dma_crop:
            return pl.pallas_call(
                _dma_crop_kernel,
                out_shape=out_shape,
                grid=grid,
                in_specs=[pl.BlockSpec(memory_space=pl.ANY)],  # input stays in HBM
                out_specs=out_spec,
                scratch_shapes=[pltpu.SemaphoreType.DMA((1,))],
                compiler_params=compiler_params,
            )(x3)
        return pl.pallas_call(
            _vmem_crop_kernel,
            out_shape=out_shape,
            grid=grid,
            in_specs=[pl.BlockSpec((tb, H_in, W_in), lambda b: (b, 0, 0))],
            out_specs=out_spec,
            compiler_params=compiler_params,
        )(x3)

    def crop(x):
        N, C, H, W = x.shape
        assert (H, W) == (H_in, W_in), (x.shape, in_dim)
        B = N * C
        itemsize = np.dtype(x.dtype).itemsize
        tb = _pick_plane_batch(
            B,
            in_plane_bytes=H_in * W_in * itemsize,
            out_plane_bytes=H_out * W_out * itemsize,
            block_budget=block_budget,
        )
        x3 = x.reshape(B, H_in, W_in)  # free: merges leading (untiled) dims only
        try:
            y3 = _call(x3, tb, use_dma_crop=True)
        except Exception:
            # TODO(synk): if this toolchain rejects the unaligned strided-window
            # DMA, fall back to the (still batched/pipelined) full-plane read +
            # in-VMEM slice, which costs ~(H_in*W_in)/(H_out*W_out) extra read.
            y3 = _call(x3, tb, use_dma_crop=False)
        return y3.reshape(N, C, H_out, W_out)

    return crop, (crop_h0, crop_h1, crop_w0, crop_w1)


if __name__ == "__main__":
    # Small deterministic example: batch=2, channels=4, spatial 16 -> 12.
    key = jax.random.PRNGKey(0)
    N, C = 2, 4
    in_dim = (16, 16)
    out_dim = (12, 12)
    x = jax.random.normal(key, (N, C, in_dim[0], in_dim[1]), dtype=jnp.float32)

    crop_fn, (h0, h1, w0, w1) = make_center_crop(in_dim, out_dim)
    y = jax.block_until_ready(crop_fn(x))

    # Reference: exactly the PyTorch slicing semantics x[..., h0:-h1, w0:-w1].
    y_ref = x[..., h0:-h1, w0:-w1]

    assert y.shape == (N, C, out_dim[0], out_dim[1]), y.shape
    np.testing.assert_allclose(np.asarray(y), np.asarray(y_ref), rtol=0, atol=0)

    print("KERNEL_OK")
</pallas_src>

<mosaic_0001>
module attributes {stable_mosaic.version = 11 : i64} {
  func.func @_dma_crop_kernel(%arg0: i32, %arg1: memref<8x16x16xf32, #tpu.memory_space<any>>, %arg2: memref<8x12x12xf32, #tpu.memory_space<vmem>>, %arg3: memref<1x!tpu.dma_semaphore, #tpu.memory_space<semaphore_mem>>) attributes {dimension_semantics = [#tpu.dimension_semantics<parallel>], iteration_bounds = array<i64: 1>, scalar_prefetch = 0 : i64, scratch_operands = 1 : i64, tpu.core_type = #tpu.core_type<tc>, window_params = [{}, {transform_indices = @transform_1, window_bounds = array<i64: 8, 12, 12>}]} {
    %c8_i32 = arith.constant 8 : i32
    %0 = arith.muli %arg0, %c8_i32 : i32
    %1 = tpu.assume_multiple %0, 8 : i32
    %c0_i32 = arith.constant 0 : i32
    %c2_i32 = arith.constant 2 : i32
    %c2_i32_0 = arith.constant 2 : i32
    %2 = tpu.memref_slice %arg1[%1, %c2_i32, %c2_i32_0] : memref<8x16x16xf32, #tpu.memory_space<any>> -> memref<8x12x12xf32, #tpu.memory_space<any>>
    %3 = tpu.memref_slice %arg3[%c0_i32] : memref<1x!tpu.dma_semaphore, #tpu.memory_space<semaphore_mem>> -> memref<1x!tpu.dma_semaphore, #tpu.memory_space<semaphore_mem>>
    %4 = tpu.memref_squeeze %3 : memref<1x!tpu.dma_semaphore, #tpu.memory_space<semaphore_mem>> -> memref<!tpu.dma_semaphore, #tpu.memory_space<semaphore_mem>>
    tpu.enqueue_dma source(%2 : memref<8x12x12xf32, #tpu.memory_space<any>>) target(%arg2 : memref<8x12x12xf32, #tpu.memory_space<vmem>>) target_semaphore(%4 : memref<!tpu.dma_semaphore, #tpu.memory_space<semaphore_mem>>)
    %c0_i32_1 = arith.constant 0 : i32
    %c2_i32_2 = arith.constant 2 : i32
    %c2_i32_3 = arith.constant 2 : i32
    %5 = tpu.memref_slice %arg1[%1, %c2_i32_2, %c2_i32_3] : memref<8x16x16xf32, #tpu.memory_space<any>> -> memref<8x12x12xf32, #tpu.memory_space<any>>
    %6 = tpu.memref_slice %arg3[%c0_i32_1] : memref<1x!tpu.dma_semaphore, #tpu.memory_space<semaphore_mem>> -> memref<1x!tpu.dma_semaphore, #tpu.memory_space<semaphore_mem>>
    %7 = tpu.memref_squeeze %6 : memref<1x!tpu.dma_semaphore, #tpu.memory_space<semaphore_mem>> -> memref<!tpu.dma_semaphore, #tpu.memory_space<semaphore_mem>>
    tpu.wait_dma2 semaphore(%7 : memref<!tpu.dma_semaphore, #tpu.memory_space<semaphore_mem>>) src(%5 : memref<8x12x12xf32, #tpu.memory_space<any>>) dst(%arg2 : memref<8x12x12xf32, #tpu.memory_space<vmem>>)
    return
  }
  func.func @transform_1(%arg0: i32) -> (i32, i32, i32) {
    %c0_i32 = arith.constant 0 : i32
    %c0_i32_0 = arith.constant 0 : i32
    %c0_i32_1 = arith.constant 0 : i32
    return %arg0, %c0_i32, %c0_i32_0 : i32, i32, i32
  }
}

module attributes {stable_mosaic.version = 11 : i64} {
  func.func @_vmem_crop_kernel(%arg0: i32, %arg1: memref<8x16x16xf32, #tpu.memory_space<vmem>>, %arg2: memref<8x12x12xf32, #tpu.memory_space<vmem>>) attributes {dimension_semantics = [#tpu.dimension_semantics<parallel>], iteration_bounds = array<i64: 1>, scalar_prefetch = 0 : i64, scratch_operands = 0 : i64, tpu.core_type = #tpu.core_type<tc>, window_params = [{transform_indices = @transform_0, window_bounds = array<i64: 8, 16, 16>}, {transform_indices = @transform_1, window_bounds = array<i64: 8, 12, 12>}]} {
    %c0 = arith.constant 0 : index
    %c2 = arith.constant 2 : index
    %c2_0 = arith.constant 2 : index
    %0 = vector.load %arg1[%c0, %c2, %c2_0] : memref<8x16x16xf32, #tpu.memory_space<vmem>>, vector<8x12x12xf32>
    %c0_1 = arith.constant 0 : index
    %c0_2 = arith.constant 0 : index
    %c0_3 = arith.constant 0 : index
    %1 = vector.load %arg2[%c0_1, %c0_2, %c0_3] : memref<8x12x12xf32, #tpu.memory_space<vmem>>, vector<8x12x12xf32>
    tpu.vector_store %arg2[%c0_1, %c0_2, %c0_3], %0 {strides = array<i32>} : memref<8x12x12xf32, #tpu.memory_space<vmem>>, vector<8x12x12xf32>,
    return
  }
  func.func @transform_0(%arg0: i32) -> (i32, i32, i32) {
    %c0_i32 = arith.constant 0 : i32
    %c0_i32_0 = arith.constant 0 : i32
    %c0_i32_1 = arith.constant 0 : i32
    return %arg0, %c0_i32, %c0_i32_0 : i32, i32, i32
  }
  func.func @transform_1(%arg0: i32) -> (i32, i32, i32) {
    %c0_i32 = arith.constant 0 : i32
    %c0_i32_0 = arith.constant 0 : i32
    %c0_i32_1 = arith.constant 0 : i32
    return %arg0, %c0_i32, %c0_i32_0 : i32, i32, i32
  }
}

</mosaic_0001>

<bundles_post_ra>
// kernel: tpu_custom_call.1
= control target key start
LH: loop header
LB: loop body
LE: loop exit
PB: predicated region body
PF: predicated region fallthrough
CT: control target
= control target key end

     0   :  { %6 = vsyncpa [#allocation3], 0  ;;  %s153_s6 = smov [#allocation2]   ;;  %s243_s0 = inlined_call_operand.hbm [shape: f32[8,16,16], index: 0, kind: input, shape index: {}]   ;;  %s244_s1 = inlined_call_operand.vmem [shape: f32[8,12,12], index: 1, kind: output, shape index: {}]  }
   0x1   :  { %s12_s7 = sshll.u32 %s153_s6, 4  ;;  %s129_s10 = scalar_lea.hbm %s243_s0, 2048  ;;  %s13_s7 = int_to_ptr.vmem [resolvable:$true] %s12_s7 }
   0x2   :  { %p130_p0 = scmp.ne.s32.totalorder %s243_s0, %s129_s10  ;;  %p133_p1 = scmp.lt.u32.totalorder %s129_s10, %s243_s0 }
   0x4   :  { %p135_p2 = pnand %p133_p1, %p130_p0 }
   0x6   :  { %138 = shalt.err (!%p135_p2)
}
   0x7   :  { %s139_s15 = scalar_lea.vmem %s13_s7, 2048  ;;  %p144_p4 = scmp.lt.s32.totalorder %s13_s7, %s13_s7 }
   0x8   :  { %p140_p3 = scmp.ne.s32.totalorder %s13_s7, %s139_s15  ;;  %p145_p5 = scmp.lt.s32.totalorder %s139_s15, %s139_s15 }
   0xa   :  { %p146_p6 = por %p145_p5, %p144_p4 }
   0xc   :  { %p147_p7 = pnand %p146_p6, %p140_p3 }
   0xe   :  { %150 = shalt.err (!%p147_p7)
}
   0xf   :  { %s154_s16 = smov 128   ;;  %s155_s17 = smov 8  }
  0x10   :  { %18 = dma.hbm_to_vmem [thread:$0]  %s243_s0, 2048, %s13_s7, [#allocation3], %s154_s16, %s154_s16, %s155_s17  }
  0x11   :  { %151 = dma.done.wait [#allocation3], 2048  }
  0x12   :  { %152 = vsyncadd [#allocation3], 4294965248  ;;  %v24_v0 = vld [vmem:[#allocation2 + $0x12] sm:$0xff]  ;;  %v22_v1 = vld [vmem:[#allocation2 + $0x2] sm:$0xff]  ;;  %s156_s20 = smov 126   ;;  %vm102_vm0 = vcmask 97280  }
  0x13   :  { %58 = vrot.lane.b32.xlu1 %v24_v0, %s156_s20  ;;  %54 = vrot.lane.b32.xlu0 %v22_v1, %s156_s20  ;;  %v25_v2 = vld [vmem:[#allocation2 + $0x1a] sm:$0xf]  ;;  %v23_v3 = vld [vmem:[#allocation2 + $0xa] sm:$0xf]  ;;  %v26_v5 = vld [vmem:[#allocation2 + $0x22] sm:$0xff]  ;;  %vm104_vm1 = vcmask 93184  }
  0x14   :  { %v27_v4 = vld [vmem:[#allocation2 + $0x2a] sm:$0xf]  ;;  %v29_v6 = vld [vmem:[#allocation2 + $0x3a] sm:$0xf]  ;;  %v28_v7 = vld [vmem:[#allocation2 + $0x32] sm:$0xff] }
  0x15   :  { %v31_v8 = vld [vmem:[#allocation2 + $0x4a] sm:$0xf]  ;;  %v30_v9 = vld [vmem:[#allocation2 + $0x42] sm:$0xff]  ;;  %v33_v10 = vld [vmem:[#allocation2 + $0x5a] sm:$0xf] }
  0x16   :  { %v32_v11 = vld [vmem:[#allocation2 + $0x52] sm:$0xff]  ;;  %v35_v12 = vld [vmem:[#allocation2 + $0x6a] sm:$0xf]  ;;  %v34_v13 = vld [vmem:[#allocation2 + $0x62] sm:$0xff] }
  0x17   :  { %60 = vrot.lane.b32.xlu1 %v25_v2, %s156_s20  ;;  %56 = vrot.lane.b32.xlu0 %v23_v3, %s156_s20  ;;  %v37_v14 = vld [vmem:[#allocation2 + $0x7a] sm:$0xf]  ;;  %v36_v15 = vld [vmem:[#allocation2 + $0x72] sm:$0xff] }
  0x1b   :  { %64 = vrot.lane.b32.xlu1 %v27_v4, %s156_s20  ;;  %62 = vrot.lane.b32.xlu0 %v26_v5, %s156_s20 }
  0x1f   :  { %68 = vrot.lane.b32.xlu1 %v29_v6, %s156_s20  ;;  %66 = vrot.lane.b32.xlu0 %v28_v7, %s156_s20 }
  0x23   :  { %72 = vrot.lane.b32.xlu1 %v31_v8, %s156_s20  ;;  %70 = vrot.lane.b32.xlu0 %v30_v9, %s156_s20 }
  0x27   :  { %76 = vrot.lane.b32.xlu1 %v33_v10, %s156_s20  ;;  %74 = vrot.lane.b32.xlu0 %v32_v11, %s156_s20 }
  0x2b   :  { %80 = vrot.lane.b32.xlu1 %v35_v12, %s156_s20  ;;  %78 = vrot.lane.b32.xlu0 %v34_v13, %s156_s20 }
  0x2f   :  { %84 = vrot.lane.b32.xlu1 %v37_v14, %s156_s20  ;;  %82 = vrot.lane.b32.xlu0 %v36_v15, %s156_s20 }
  0x85   :  { %v59_v16 = vpop.permute.xlu1 %58  ;;  %v55_v17 = vpop.permute.xlu0 %54 }
  0x86   :  { %106 = vst.msk [vmem:[%s244_s1 + $0x10] sm:$0xff] %vm102_vm0, %v59_v16  ;;  %103 = vst.msk [vmem:[%s244_s1] sm:$0xff] %vm102_vm0, %v55_v17 }
  0x89   :  { %v61_v18 = vpop.permute.xlu1 %60  ;;  %v57_v19 = vpop.permute.xlu0 %56 }
  0x8a   :  { %107 = vst.msk [vmem:[%s244_s1 + $0x18] sm:$0xf] %vm104_vm1, %v61_v18  ;;  %105 = vst.msk [vmem:[%s244_s1 + $0x8] sm:$0xf] %vm104_vm1, %v57_v19 }
  0x8d   :  { %v65_v20 = vpop.permute.xlu1 %64  ;;  %v63_v21 = vpop.permute.xlu0 %62 }
  0x8e   :  { %109 = vst.msk [vmem:[%s244_s1 + $0x28] sm:$0xf] %vm104_vm1, %v65_v20 }
  0x8f   :  { %108 = vst.msk [vmem:[%s244_s1 + $0x20] sm:$0xff] %vm102_vm0, %v63_v21 }
  0x91   :  { %v69_v22 = vpop.permute.xlu1 %68  ;;  %v67_v23 = vpop.permute.xlu0 %66 }
  0x92   :  { %111 = vst.msk [vmem:[%s244_s1 + $0x38] sm:$0xf] %vm104_vm1, %v69_v22 }
  0x93   :  { %110 = vst.msk [vmem:[%s244_s1 + $0x30] sm:$0xff] %vm102_vm0, %v67_v23 }
  0x95   :  { %v73_v24 = vpop.permute.xlu1 %72  ;;  %v71_v25 = vpop.permute.xlu0 %70 }
  0x96   :  { %113 = vst.msk [vmem:[%s244_s1 + $0x48] sm:$0xf] %vm104_vm1, %v73_v24 }
  0x97   :  { %112 = vst.msk [vmem:[%s244_s1 + $0x40] sm:$0xff] %vm102_vm0, %v71_v25 }
  0x99   :  { %v77_v26 = vpop.permute.xlu1 %76  ;;  %v75_v27 = vpop.permute.xlu0 %74 }
  0x9a   :  { %115 = vst.msk [vmem:[%s244_s1 + $0x58] sm:$0xf] %vm104_vm1, %v77_v26 }
  0x9b   :  { %114 = vst.msk [vmem:[%s244_s1 + $0x50] sm:$0xff] %vm102_vm0, %v75_v27 }
  0x9d   :  { %v81_v28 = vpop.permute.xlu1 %80  ;;  %v79_v29 = vpop.permute.xlu0 %78 }
  0x9e   :  { %117 = vst.msk [vmem:[%s244_s1 + $0x68] sm:$0xf] %vm104_vm1, %v81_v28 }
  0x9f   :  { %116 = vst.msk [vmem:[%s244_s1 + $0x60] sm:$0xff] %vm102_vm0, %v79_v29 }
  0xa1   :  { %v85_v30 = vpop.permute.xlu1 %84  ;;  %v83_v31 = vpop.permute.xlu0 %82 }
  0xa2   :  { %119 = vst.msk [vmem:[%s244_s1 + $0x78] sm:$0xf] %vm104_vm1, %v85_v30 }
  0xa3   :  { %118 = vst.msk [vmem:[%s244_s1 + $0x70] sm:$0xff] %vm102_vm0, %v83_v31 }
  0xa4   :  { %124 = vsyncpa [#allocation3], 1 }

</bundles_post_ra>
